<compile_context>
chip_gen: v5e
topology: v5e:2x2
jax: 0.10.0
libtpu: 0.0.40
codegen_flags: <defaults>
</compile_context>

<pallas_src>
import math

import jax
import jax.numpy as jnp
from jax.experimental import pallas as pl
from jax.experimental.pallas import tpu as pltpu


def critic_kernel(state_ref, action_ref, w1s_ref, w1a_ref, b1_ref, w2_ref,
                  b2_ref, out_ref):
    """One batch tile of the fused Critic forward (all operands in VMEM/SMEM)."""
    # lin1 with the concat folded in:  [TB,S]@[S,H] + [TB,A]@[A,H]   (MXU)
    h = jnp.dot(state_ref[...], w1s_ref[...],
                preferred_element_type=jnp.float32)
    h = h + jnp.dot(action_ref[...], w1a_ref[...],
                    preferred_element_type=jnp.float32)
    h = jnp.maximum(h + b1_ref[...], 0.0)                  # bias + ReLU (VPU)
    # lin2 (hidden -> 1): elementwise mul + lane reduction (VPU/XLU), not MXU.
    out = jnp.sum(h * w2_ref[...], axis=-1, keepdims=True) + b2_ref[0, 0]
    out_ref[...] = out.astype(out_ref.dtype)


def critic_forward(state, action, params, *, batch_tile=512):
    """Fused Critic forward. params = (w1[inp,H], b1[1,H], w2[H,1], b2[1,1])."""
    w1, b1, w2, b2 = params
    B, state_dim = state.shape
    Ba, action_dim = action.shape
    assert B == Ba
    inp_size, hidden = w1.shape
    assert inp_size == state_dim + action_dim

    # Split W1 once on the host so the concat fuses into the kernel.
    w1_s = w1[:state_dim]                       # [S, H]
    w1_a = w1[state_dim:]                       # [A, H]
    w2_row = w2.reshape(1, hidden)              # [1, H] lane-reduction form
    b1_row = b1.reshape(1, hidden)              # [1, H]
    b2_s = b2.reshape(1, 1)                     # scalar -> SMEM

    # Batch tile: big tiles amortize the ~0.35us/grid-step overhead; rows are
    # independent, so Pallas masks any ragged final tile correctly.
    tb = min(batch_tile, B)
    grid = (pl.cdiv(B, tb),)

    flops = 2 * B * inp_size * hidden + 3 * B * hidden
    bytes_accessed = 4 * (B * (state_dim + action_dim)   # activations in
                          + inp_size * hidden + 2 * hidden + 1  # weights/bias
                          + B)                            # output

    return pl.pallas_call(
        critic_kernel,
        out_shape=jax.ShapeDtypeStruct((B, 1), jnp.float32),
        grid=grid,
        in_specs=[
            pl.BlockSpec((tb, state_dim), lambda i: (i, 0)),
            pl.BlockSpec((tb, action_dim), lambda i: (i, 0)),
            # Weights/biases: same block every step -> stay VMEM-resident.
            pl.BlockSpec((state_dim, hidden), lambda i: (0, 0)),
            pl.BlockSpec((action_dim, hidden), lambda i: (0, 0)),
            pl.BlockSpec((1, hidden), lambda i: (0, 0)),
            pl.BlockSpec((1, hidden), lambda i: (0, 0)),
            # b2: one scalar in SMEM (no padded VMEM tile, no per-step DMA).
            pl.BlockSpec(memory_space=pltpu.MemorySpace.SMEM),
        ],
        out_specs=pl.BlockSpec((tb, 1), lambda i: (i, 0)),
        compiler_params=pltpu.CompilerParams(
            dimension_semantics=("parallel",)),   # split batch tiles across TCs (v7x)
        cost_estimate=pl.CostEstimate(
            flops=flops, transcendentals=0, bytes_accessed=bytes_accessed),
    )(state, action, w1_s, w1_a, b1_row, w2_row, b2_s)


def init_critic_params(key, inp_size, hidden=256):
    """Deterministic init mirroring nn.Linear's default U(-1/sqrt(fan_in), +)."""
    k1, k2, k3, k4 = jax.random.split(key, 4)
    bound1 = 1.0 / math.sqrt(inp_size)
    bound2 = 1.0 / math.sqrt(hidden)
    w1 = jax.random.uniform(k1, (inp_size, hidden), jnp.float32, -bound1, bound1)
    b1 = jax.random.uniform(k2, (1, hidden), jnp.float32, -bound1, bound1)
    w2 = jax.random.uniform(k3, (hidden, 1), jnp.float32, -bound2, bound2)
    b2 = jax.random.uniform(k4, (1, 1), jnp.float32, -bound2, bound2)
    return (w1, b1, w2, b2)


if __name__ == "__main__":
    key = jax.random.PRNGKey(0)
    k_state, k_action, k_params = jax.random.split(key, 3)

    batch = 256          # small demo; batch_tile=128 -> grid=(2,) exercises the pipeline
    state_dim = 24
    action_dim = 8
    inp_size = state_dim + action_dim
    hidden = 256         # module default; multiple of 128 keeps vregs lane-dense

    state = jax.random.normal(k_state, (batch, state_dim), jnp.float32)
    action = jax.random.normal(k_action, (batch, action_dim), jnp.float32)
    params = init_critic_params(k_params, inp_size, hidden)

    out = critic_forward(state, action, params, batch_tile=128)
    out = jax.block_until_ready(out)

    # Pure-JAX reference mirroring the PyTorch forward. Tolerance accounts for
    # XLA's default f32 dot on TPU possibly using bf16 MXU passes while the
    # kernel's hidden->1 projection is an exact f32 lane reduction.
    x = jnp.concatenate([state, action], axis=-1)
    ref = jnp.maximum(x @ params[0] + params[1], 0.0) @ params[2] + params[3]
    assert out.shape == (batch, 1)
    assert jnp.allclose(out, ref, atol=5e-3, rtol=5e-3), (
        float(jnp.max(jnp.abs(out - ref))))

    print("KERNEL_OK")
</pallas_src>

<mosaic_0001>
module attributes {stable_mosaic.version = 11 : i64} {
  func.func @critic_kernel(%arg0: i32, %arg1: memref<128x24xf32, #tpu.memory_space<vmem>>, %arg2: memref<128x8xf32, #tpu.memory_space<vmem>>, %arg3: memref<24x256xf32, #tpu.memory_space<vmem>>, %arg4: memref<8x256xf32, #tpu.memory_space<vmem>>, %arg5: memref<1x256xf32, #tpu.memory_space<vmem>>, %arg6: memref<1x256xf32, #tpu.memory_space<vmem>>, %arg7: memref<1x1xf32, #tpu.memory_space<smem>>, %arg8: memref<128x1xf32, #tpu.memory_space<vmem>>) attributes {dimension_semantics = [#tpu.dimension_semantics<parallel>], iteration_bounds = array<i64: 2>, scalar_prefetch = 0 : i64, scratch_operands = 0 : i64, tpu.core_type = #tpu.core_type<tc>, window_params = [{transform_indices = @transform_0, window_bounds = array<i64: 128, 24>}, {transform_indices = @transform_1, window_bounds = array<i64: 128, 8>}, {pipeline_mode = #tpu.pipeline_mode<synchronous>, transform_indices = @transform_2, window_bounds = array<i64: 24, 256>}, {pipeline_mode = #tpu.pipeline_mode<synchronous>, transform_indices = @transform_3, window_bounds = array<i64: 8, 256>}, {pipeline_mode = #tpu.pipeline_mode<synchronous>, transform_indices = @transform_4, window_bounds = array<i64: 1, 256>}, {pipeline_mode = #tpu.pipeline_mode<synchronous>, transform_indices = @transform_5, window_bounds = array<i64: 1, 256>}, {transform_indices = @transform_6, window_bounds = array<i64: 1, 1>}, {transform_indices = @transform_7, window_bounds = array<i64: 128, 1>}]} {
    %c0 = arith.constant 0 : index
    %c0_0 = arith.constant 0 : index
    %0 = vector.load %arg1[%c0, %c0_0] : memref<128x24xf32, #tpu.memory_space<vmem>>, vector<128x24xf32>
    %c0_1 = arith.constant 0 : index
    %c0_2 = arith.constant 0 : index
    %1 = vector.load %arg3[%c0_1, %c0_2] : memref<24x256xf32, #tpu.memory_space<vmem>>, vector<24x256xf32>
    %cst = arith.constant dense<0.000000e+00> : vector<128x256xf32>
    %2 = tpu.matmul %0, %1, %cst {dimension_numbers = #tpu.dot_dimension_numbers<[1], [0], [0], [1], [0, 0, 1, 1], [], []>} : vector<128x24xf32>, vector<24x256xf32>, vector<128x256xf32> -> vector<128x256xf32>
    %c0_3 = arith.constant 0 : index
    %c0_4 = arith.constant 0 : index
    %3 = vector.load %arg2[%c0_3, %c0_4] : memref<128x8xf32, #tpu.memory_space<vmem>>, vector<128x8xf32>
    %c0_5 = arith.constant 0 : index
    %c0_6 = arith.constant 0 : index
    %4 = vector.load %arg4[%c0_5, %c0_6] : memref<8x256xf32, #tpu.memory_space<vmem>>, vector<8x256xf32>
    %cst_7 = arith.constant dense<0.000000e+00> : vector<128x256xf32>
    %5 = tpu.matmul %3, %4, %cst_7 {dimension_numbers = #tpu.dot_dimension_numbers<[1], [0], [0], [1], [0, 0, 1, 1], [], []>} : vector<128x8xf32>, vector<8x256xf32>, vector<128x256xf32> -> vector<128x256xf32>
    %6 = arith.addf %2, %5 : vector<128x256xf32>
    %c0_8 = arith.constant 0 : index
    %c0_9 = arith.constant 0 : index
    %7 = vector.load %arg5[%c0_8, %c0_9] : memref<1x256xf32, #tpu.memory_space<vmem>>, vector<1x256xf32>
    %8 = vector.broadcast %7 : vector<1x256xf32> to vector<128x256xf32>
    %9 = arith.addf %6, %8 : vector<128x256xf32>
    %cst_10 = arith.constant 0.000000e+00 : f32
    %10 = vector.broadcast %cst_10 : f32 to vector<128x256xf32>
    %11 = arith.maximumf %9, %10 : vector<128x256xf32>
    %c0_11 = arith.constant 0 : index
    %c0_12 = arith.constant 0 : index
    %12 = vector.load %arg6[%c0_11, %c0_12] : memref<1x256xf32, #tpu.memory_space<vmem>>, vector<1x256xf32>
    %13 = vector.broadcast %12 : vector<1x256xf32> to vector<128x256xf32>
    %14 = arith.mulf %11, %13 : vector<128x256xf32>
    %cst_13 = arith.constant dense<0.000000e+00> : vector<128xf32>
    %15 = vector.multi_reduction <add>, %14, %cst_13 [1] : vector<128x256xf32> to vector<128xf32>
    %16 = vector.shape_cast %15 : vector<128xf32> to vector<128x1xf32>
    %c0_14 = arith.constant 0 : index
    %c0_15 = arith.constant 0 : index
    %17 = memref.load %arg7[%c0_14, %c0_15] : memref<1x1xf32, #tpu.memory_space<smem>>
    %18 = vector.broadcast %17 : f32 to vector<128x1xf32>
    %19 = arith.addf %16, %18 : vector<128x1xf32>
    %c0_16 = arith.constant 0 : index
    %c0_17 = arith.constant 0 : index
    %20 = vector.load %arg8[%c0_16, %c0_17] : memref<128x1xf32, #tpu.memory_space<vmem>>, vector<128x1xf32>
    tpu.vector_store %arg8[%c0_16, %c0_17], %19 {strides = array<i32>} : memref<128x1xf32, #tpu.memory_space<vmem>>, vector<128x1xf32>,
    return
  }
  func.func @transform_0(%arg0: i32) -> (i32, i32) {
    %c0_i32 = arith.constant 0 : i32
    %c0_i32_0 = arith.constant 0 : i32
    return %arg0, %c0_i32 : i32, i32
  }
  func.func @transform_1(%arg0: i32) -> (i32, i32) {
    %c0_i32 = arith.constant 0 : i32
    %c0_i32_0 = arith.constant 0 : i32
    return %arg0, %c0_i32 : i32, i32
  }
  func.func @transform_2(%arg0: i32) -> (i32, i32) {
    %c0_i32 = arith.constant 0 : i32
    %c0_i32_0 = arith.constant 0 : i32
    %c0_i32_1 = arith.constant 0 : i32
    return %c0_i32, %c0_i32_0 : i32, i32
  }
  func.func @transform_3(%arg0: i32) -> (i32, i32) {
    %c0_i32 = arith.constant 0 : i32
    %c0_i32_0 = arith.constant 0 : i32
    %c0_i32_1 = arith.constant 0 : i32
    return %c0_i32, %c0_i32_0 : i32, i32
  }
  func.func @transform_4(%arg0: i32) -> (i32, i32) {
    %c0_i32 = arith.constant 0 : i32
    %c0_i32_0 = arith.constant 0 : i32
    %c0_i32_1 = arith.constant 0 : i32
    return %c0_i32, %c0_i32_0 : i32, i32
  }
  func.func @transform_5(%arg0: i32) -> (i32, i32) {
    %c0_i32 = arith.constant 0 : i32
    %c0_i32_0 = arith.constant 0 : i32
    %c0_i32_1 = arith.constant 0 : i32
    return %c0_i32, %c0_i32_0 : i32, i32
  }
  func.func @transform_6(%arg0: i32) -> (i32, i32) {
    %c0_i32 = arith.constant 0 : i32
    %c0_i32_0 = arith.constant 0 : i32
    %c0_i32_1 = arith.constant 0 : i32
    return %c0_i32, %c0_i32_0 : i32, i32
  }
  func.func @transform_7(%arg0: i32) -> (i32, i32) {
    %c0_i32 = arith.constant 0 : i32
    %c0_i32_0 = arith.constant 0 : i32
    return %arg0, %c0_i32 : i32, i32
  }
}

</mosaic_0001>

<bundles_post_ra>
// kernel: tpu_custom_call.1
= control target key start
LH: loop header
LB: loop body
LE: loop exit
PB: predicated region body
PF: predicated region fallthrough
CT: control target
= control target key end

     0   :  { %s1098_s26 = smov 0   ;;  %s1359_s0 = inlined_call_operand.vmem [shape: f32[256,24], index: 0, kind: input, shape index: {}]   ;;  %s1360_s1 = inlined_call_operand.vmem [shape: f32[256,8], index: 1, kind: input, shape index: {}]   ;;  %s1361_s2 = inlined_call_operand.vmem [shape: f32[24,256], index: 2, kind: input, shape index: {}]   ;;  %s1362_s3 = inlined_call_operand.vmem [shape: f32[8,256], index: 3, kind: input, shape index: {}]   ;;  %s1363_s4 = inlined_call_operand.vmem [shape: f32[1,256], index: 4, kind: input, shape index: {}]   ;;  %s1364_s5 = inlined_call_operand.vmem [shape: f32[1,256], index: 5, kind: input, shape index: {}]   ;;  %s1365_s6 = inlined_call_operand.<no memory space> [shape: f32[1,1], index: 6, kind: input, shape index: {}]   ;;  %s1366_s7 = inlined_call_operand.vmem [shape: f32[256,1], index: 7, kind: output, shape index: {}]  }
   0x1   :  { %12 = sst [smem:[#allocation2]] %s1365_s6 }
   0x2 LB: > { %s962_s27 = sadd.s32 4294967295, %s1053_s26   ;;  %p966_p0 = scmp.ge.s32.totalorder %s1053_s26, 1  ;;  %s1053_s26 = sphi %s1098_s26, %s18_s26  }
   0x3   : > { %p250_p1 = scmp.lt.s32.totalorder %s1053_s26, 3 }
   0x5   : > { %p251_p2 = pnand %p966_p0, %p250_p1 }
   0x6   : > { %s967_s10 = sshll.u32 (!%p251_p2), %s962_s27, 4  ;;  %s859_s9 = sld [smem:[#allocation2]] (!%p251_p2) }
   0x7   : > { %254 = sbr.rel (%p251_p2) target bundleno = 399 (0x18f), region = 48  ;;  %p288_p3 = scmp.lt.s32.totalorder (!%p251_p2), %s967_s10, 31 }
   0xc   : > { %v325_v0 = vld [vmem:[%s1361_s2 + $0x20] sm:$0xff]  ;;  %v326_v1 = vld [vmem:[%s1361_s2 + $0x28] sm:$0xff]  ;;  %v323_v2 = vld [vmem:[%s1361_s2 + $0x10] sm:$0xff]  ;;  %s1368_s10 = smov (!%p288_p3, %s967_s10), 31  ;;  %vm524_vm0 = vcmask 195584   ;;  %vm345_vm1 = vcmask 64512  }
   0xd   : > { %586 = vmatpush.msra.mxu2 %v325_v0  ;;  %651 = vmatpush.msra.mxu3 %v326_v1  ;;  %v324_v3 = vld [vmem:[%s1361_s2 + $0x18] sm:$0xff]  ;;  %v321_v4 = vld [vmem:[%s1361_s2] sm:$0xff]  ;;  %v322_v5 = vld [vmem:[%s1361_s2 + $0x8] sm:$0xff]  ;;  %s1130_s21 = sshll.u32 %s1368_s10, 3  ;;  %vm877_vm2 = vcmask 7168  }
   0xe   : > { %v343_v6 = vld [vmem:[%s1362_s3] sm:$0xff]  ;;  %v344_v7 = vld [vmem:[%s1362_s3 + $0x8] sm:$0xff]  ;;  %s1136_s24 = scalar_lea.vmem %s1359_s0, %s1130_s21  ;;  %s1142_s28 = scalar_lea.vmem %s1360_s1, %s1130_s21 }
   0xf   : > { %587 = vmatpush.msra.mxu2 %v323_v2  ;;  %652 = vmatpush.msra.mxu3 %v324_v3  ;;  %v305_v8 = vld [vmem:[%s1136_s24] sm:$0xff]  ;;  %v306_v10 = vld [vmem:[%s1136_s24 + $0x8] sm:$0xff]  ;;  %v307_v12 = vld [vmem:[%s1136_s24 + $0x10] sm:$0xff]  ;;  %s1320_s12 = scalar_lea.vmem %s1366_s7, %s1130_s21 }
  0x10   : > { %409 = vmatpush.msra.mxu0 %v343_v6  ;;  %474 = vmatpush.msra.mxu1 %v344_v7  ;;  %v327_v9 = vld [vmem:[%s1142_s28] sm:$0xff]  ;;  %v328_v11 = vld [vmem:[%s1142_s28 + $0x8] sm:$0xff]  ;;  %v329_v13 = vld [vmem:[%s1142_s28 + $0x10] sm:$0xff] }
  0x11   : > { %588 = vmatpush.msra.mxu2 %v321_v4  ;;  %653 = vmatpush.msra.mxu3 %v322_v5  ;;  %v308_v14 = vld [vmem:[%s1136_s24 + $0x18] sm:$0xff]  ;;  %v309_v16 = vld [vmem:[%s1136_s24 + $0x20] sm:$0xff]  ;;  %v310_v18 = vld [vmem:[%s1136_s24 + $0x28] sm:$0xff] }
  0x12   : > { %1005 = vmatmul.msk.f32.vlgmr.msra.gmra.mxu2 %vm524_vm0, %v305_v8  ;;  %1021 = vmatmul.msk.f32.vlgmr.msra.gmra.mxu3 %vm524_vm0, %v305_v8  ;;  %v330_v15 = vld [vmem:[%s1142_s28 + $0x18] sm:$0xff]  ;;  %v331_v17 = vld [vmem:[%s1142_s28 + $0x20] sm:$0xff]  ;;  %v332_v19 = vld [vmem:[%s1142_s28 + $0x28] sm:$0xff] }
  0x13   : > { %973 = vmatmul.msk.f32.vlgmr.msra.gmra.mxu0 %vm345_vm1, %v327_v9  ;;  %989 = vmatmul.msk.f32.vlgmr.msra.gmra.mxu1 %vm345_vm1, %v327_v9  ;;  %v311_v20 = vld [vmem:[%s1136_s24 + $0x30] sm:$0xff]  ;;  %v312_v22 = vld [vmem:[%s1136_s24 + $0x38] sm:$0xff]  ;;  %v313_v24 = vld [vmem:[%s1136_s24 + $0x40] sm:$0xff] }
  0x14   : > { %v333_v21 = vld [vmem:[%s1142_s28 + $0x30] sm:$0xff]  ;;  %v334_v23 = vld [vmem:[%s1142_s28 + $0x38] sm:$0xff]  ;;  %v335_v25 = vld [vmem:[%s1142_s28 + $0x40] sm:$0xff] }
  0x15   : > { %v314_v26 = vld [vmem:[%s1136_s24 + $0x48] sm:$0xff]  ;;  %v315_v28 = vld [vmem:[%s1136_s24 + $0x50] sm:$0xff]  ;;  %v316_v30 = vld [vmem:[%s1136_s24 + $0x58] sm:$0xff] }
  0x16   : > { %v336_v27 = vld [vmem:[%s1142_s28 + $0x48] sm:$0xff]  ;;  %v337_v29 = vld [vmem:[%s1142_s28 + $0x50] sm:$0xff]  ;;  %v338_v31 = vld [vmem:[%s1142_s28 + $0x58] sm:$0xff] }
  0x17   : > { %v317_v32 = vld [vmem:[%s1136_s24 + $0x60] sm:$0xff]  ;;  %v318_v34 = vld [vmem:[%s1136_s24 + $0x68] sm:$0xff]  ;;  %v319_v36 = vld [vmem:[%s1136_s24 + $0x70] sm:$0xff] }
  0x18   : > { %v339_v33 = vld [vmem:[%s1142_s28 + $0x60] sm:$0xff]  ;;  %v340_v35 = vld [vmem:[%s1142_s28 + $0x68] sm:$0xff]  ;;  %v341_v37 = vld [vmem:[%s1142_s28 + $0x70] sm:$0xff] }
  0x19   : > { %v320_v38 = vld [vmem:[%s1136_s24 + $0x78] sm:$0xff]  ;;  %v703_v42 = vld [vmem:[%s1363_s4] sm:$0x3] }
  0x1a   : > { %1006 = vmatmul.msk.f32.gmra.mxu2 %vm524_vm0, %v306_v10  ;;  %1022 = vmatmul.msk.f32.gmra.mxu3 %vm524_vm0, %v306_v10  ;;  %v342_v39 = vld [vmem:[%s1142_s28 + $0x78] sm:$0xff]  ;;  %v1243_v43 = vperm.slane %v703_v42, 0  ;;  %v1245_v44 = vperm.slane %v703_v42, 1  ;;  %v773_v47 = vld [vmem:[%s1364_s5] sm:$0x3] }
  0x1b   : > { %974 = vmatmul.msk.f32.gmra.mxu0 %vm345_vm1, %v328_v11  ;;  %990 = vmatmul.msk.f32.gmra.mxu1 %vm345_vm1, %v328_v11  ;;  %v1252_v54 = vperm.slane %v773_v47, 0  ;;  %v1254_v55 = vperm.slane %v773_v47, 1 }
  0x22   : > { %1007 = vmatmul.msk.f32.gmra.mxu2 %vm524_vm0, %v307_v12  ;;  %1023 = vmatmul.msk.f32.gmra.mxu3 %vm524_vm0, %v307_v12 }
  0x23   : > { %975 = vmatmul.msk.f32.gmra.mxu0 %vm345_vm1, %v329_v13  ;;  %991 = vmatmul.msk.f32.gmra.mxu1 %vm345_vm1, %v329_v13 }
  0x2a   : > { %1008 = vmatmul.msk.f32.gmra.mxu2 %vm524_vm0, %v308_v14  ;;  %1024 = vmatmul.msk.f32.gmra.mxu3 %vm524_vm0, %v308_v14 }
  0x2b   : > { %976 = vmatmul.msk.f32.gmra.mxu0 %vm345_vm1, %v330_v15  ;;  %992 = vmatmul.msk.f32.gmra.mxu1 %vm345_vm1, %v330_v15 }
  0x32   : > { %1009 = vmatmul.msk.f32.gmra.mxu2 %vm524_vm0, %v309_v16  ;;  %1025 = vmatmul.msk.f32.gmra.mxu3 %vm524_vm0, %v309_v16 }
  0x33   : > { %977 = vmatmul.msk.f32.gmra.mxu0 %vm345_vm1, %v331_v17  ;;  %993 = vmatmul.msk.f32.gmra.mxu1 %vm345_vm1, %v331_v17 }
  0x3a   : > { %1010 = vmatmul.msk.f32.gmra.mxu2 %vm524_vm0, %v310_v18  ;;  %1026 = vmatmul.msk.f32.gmra.mxu3 %vm524_vm0, %v310_v18 }
  0x3b   : > { %978 = vmatmul.msk.f32.gmra.mxu0 %vm345_vm1, %v332_v19  ;;  %994 = vmatmul.msk.f32.gmra.mxu1 %vm345_vm1, %v332_v19 }
  0x42   : > { %1011 = vmatmul.msk.f32.gmra.mxu2 %vm524_vm0, %v311_v20  ;;  %1027 = vmatmul.msk.f32.gmra.mxu3 %vm524_vm0, %v311_v20 }
  0x43   : > { %979 = vmatmul.msk.f32.gmra.mxu0 %vm345_vm1, %v333_v21  ;;  %995 = vmatmul.msk.f32.gmra.mxu1 %vm345_vm1, %v333_v21 }
  0x4a   : > { %1012 = vmatmul.msk.f32.gmra.mxu2 %vm524_vm0, %v312_v22  ;;  %1028 = vmatmul.msk.f32.gmra.mxu3 %vm524_vm0, %v312_v22 }
  0x4b   : > { %980 = vmatmul.msk.f32.gmra.mxu0 %vm345_vm1, %v334_v23  ;;  %996 = vmatmul.msk.f32.gmra.mxu1 %vm345_vm1, %v334_v23 }
  0x52   : > { %1013 = vmatmul.msk.f32.gmra.mxu2 %vm524_vm0, %v313_v24  ;;  %1029 = vmatmul.msk.f32.gmra.mxu3 %vm524_vm0, %v313_v24 }
  0x53   : > { %981 = vmatmul.msk.f32.gmra.mxu0 %vm345_vm1, %v335_v25  ;;  %997 = vmatmul.msk.f32.gmra.mxu1 %vm345_vm1, %v335_v25 }
  0x5a   : > { %1014 = vmatmul.msk.f32.gmra.mxu2 %vm524_vm0, %v314_v26  ;;  %1030 = vmatmul.msk.f32.gmra.mxu3 %vm524_vm0, %v314_v26 }
  0x5b   : > { %982 = vmatmul.msk.f32.gmra.mxu0 %vm345_vm1, %v336_v27  ;;  %998 = vmatmul.msk.f32.gmra.mxu1 %vm345_vm1, %v336_v27 }
  0x62   : > { %1015 = vmatmul.msk.f32.gmra.mxu2 %vm524_vm0, %v315_v28  ;;  %1031 = vmatmul.msk.f32.gmra.mxu3 %vm524_vm0, %v315_v28 }
  0x63   : > { %983 = vmatmul.msk.f32.gmra.mxu0 %vm345_vm1, %v337_v29  ;;  %999 = vmatmul.msk.f32.gmra.mxu1 %vm345_vm1, %v337_v29 }
  0x6a   : > { %1016 = vmatmul.msk.f32.gmra.mxu2 %vm524_vm0, %v316_v30  ;;  %1032 = vmatmul.msk.f32.gmra.mxu3 %vm524_vm0, %v316_v30 }
  0x6b   : > { %984 = vmatmul.msk.f32.gmra.mxu0 %vm345_vm1, %v338_v31  ;;  %1000 = vmatmul.msk.f32.gmra.mxu1 %vm345_vm1, %v338_v31 }
  0x72   : > { %1017 = vmatmul.msk.f32.gmra.mxu2 %vm524_vm0, %v317_v32  ;;  %1033 = vmatmul.msk.f32.gmra.mxu3 %vm524_vm0, %v317_v32 }
  0x73   : > { %985 = vmatmul.msk.f32.gmra.mxu0 %vm345_vm1, %v339_v33  ;;  %1001 = vmatmul.msk.f32.gmra.mxu1 %vm345_vm1, %v339_v33 }
  0x7a   : > { %1018 = vmatmul.msk.f32.gmra.mxu2 %vm524_vm0, %v318_v34  ;;  %1034 = vmatmul.msk.f32.gmra.mxu3 %vm524_vm0, %v318_v34 }
  0x7b   : > { %986 = vmatmul.msk.f32.gmra.mxu0 %vm345_vm1, %v340_v35  ;;  %1002 = vmatmul.msk.f32.gmra.mxu1 %vm345_vm1, %v340_v35 }
  0x82   : > { %1019 = vmatmul.msk.f32.gmra.mxu2 %vm524_vm0, %v319_v36  ;;  %1035 = vmatmul.msk.f32.gmra.mxu3 %vm524_vm0, %v319_v36 }
  0x83   : > { %987 = vmatmul.msk.f32.gmra.mxu0 %vm345_vm1, %v341_v37  ;;  %1003 = vmatmul.msk.f32.gmra.mxu1 %vm345_vm1, %v341_v37 }
  0x8a   : > { %1020 = vmatmul.msk.f32.gmra.mxu2 %vm524_vm0, %v320_v38  ;;  %1036 = vmatmul.msk.f32.gmra.mxu3 %vm524_vm0, %v320_v38 }
  0x8b   : > { %988 = vmatmul.msk.f32.gmra.mxu0 %vm345_vm1, %v342_v39  ;;  %1004 = vmatmul.msk.f32.gmra.mxu1 %vm345_vm1, %v342_v39 }
  0x90   : > { %v411_v40 = vpop.f32.mrf.mxu0  ;;  %v476_v41 = vpop.f32.mrf.mxu1 }
  0x95   : > { %v590_v45 = vpop.f32.mrf.mxu2  ;;  %v655_v46 = vpop.f32.mrf.mxu3 }
  0x96   : > { %v591_v48 = vadd.f32 %v590_v45, %v411_v40  ;;  %v656_v49 = vadd.f32 %v655_v46, %v476_v41 }
  0x98   : > { %v709_v50 = vadd.f32 %v1243_v43, %v591_v48  ;;  %v710_v51 = vadd.f32 %v1245_v44, %v656_v49  ;;  %v414_v52 = vpop.f32.mrf.mxu0  ;;  %v479_v53 = vpop.f32.mrf.mxu1 }
  0x9a   : > { %v741_v56 = vmax.f32 %v709_v50, 0.0  ;;  %v742_v57 = vmax.f32 %v710_v51, 0.0 }
  0x9c   : > { %v779_v58 = vmul.f32 %v1252_v54, %v741_v56  ;;  %v780_v59 = vmul.f32 %v1254_v55, %v742_v57 }
  0x9d   : > { %v593_v60 = vpop.f32.mrf.mxu2  ;;  %v658_v61 = vpop.f32.mrf.mxu3 }
  0x9e   : > { %v594_v62 = vadd.f32 %v593_v60, %v414_v52  ;;  %v659_v63 = vadd.f32 %v658_v61, %v479_v53  ;;  %v811_v0 = vadd.f32 %v780_v59, %v779_v58 }
  0xa0   : > { %v711_v1 = vadd.f32 %v1243_v43, %v594_v62  ;;  %v712_v2 = vadd.f32 %v1245_v44, %v659_v63  ;;  %812 = vadd.xlane.f32.xlu0 %v811_v0  ;;  %v417_v3 = vpop.f32.mrf.mxu0  ;;  %v482_v4 = vpop.f32.mrf.mxu1 }
  0xa2   : > { %v743_v5 = vmax.f32 %v711_v1, 0.0  ;;  %v744_v6 = vmax.f32 %v712_v2, 0.0 }
  0xa4   : > { %v781_v7 = vmul.f32 %v1252_v54, %v743_v5  ;;  %v782_v8 = vmul.f32 %v1254_v55, %v744_v6 }
  0xa5   : > { %v596_v9 = vpop.f32.mrf.mxu2  ;;  %v661_v10 = vpop.f32.mrf.mxu3 }
  0xa6   : > { %v597_v11 = vadd.f32 %v596_v9, %v417_v3  ;;  %v662_v12 = vadd.f32 %v661_v10, %v482_v4  ;;  %v814_v13 = vadd.f32 %v782_v8, %v781_v7 }
  0xa8   : > { %v713_v14 = vadd.f32 %v1243_v43, %v597_v11  ;;  %v714_v15 = vadd.f32 %v1245_v44, %v662_v12  ;;  %815 = vadd.xlane.f32.xlu0 %v814_v13  ;;  %v420_v16 = vpop.f32.mrf.mxu0  ;;  %v485_v17 = vpop.f32.mrf.mxu1 }
  0xaa   : > { %v745_v18 = vmax.f32 %v713_v14, 0.0  ;;  %v746_v19 = vmax.f32 %v714_v15, 0.0 }
  0xac   : > { %v783_v20 = vmul.f32 %v1252_v54, %v745_v18  ;;  %v784_v21 = vmul.f32 %v1254_v55, %v746_v19 }
  0xad   : > { %v599_v22 = vpop.f32.mrf.mxu2  ;;  %v664_v23 = vpop.f32.mrf.mxu3 }
  0xae   : > { %v600_v24 = vadd.f32 %v599_v22, %v420_v16  ;;  %v665_v25 = vadd.f32 %v664_v23, %v485_v17  ;;  %v817_v26 = vadd.f32 %v784_v21, %v783_v20 }
  0xb0   : > { %v715_v27 = vadd.f32 %v1243_v43, %v600_v24  ;;  %v716_v28 = vadd.f32 %v1245_v44, %v665_v25  ;;  %818 = vadd.xlane.f32.xlu1 %v817_v26  ;;  %v423_v29 = vpop.f32.mrf.mxu0  ;;  %v488_v30 = vpop.f32.mrf.mxu1 }
  0xb2   : > { %v747_v31 = vmax.f32 %v715_v27, 0.0  ;;  %v748_v32 = vmax.f32 %v716_v28, 0.0 }
  0xb4   : > { %v785_v33 = vmul.f32 %v1252_v54, %v747_v31  ;;  %v786_v34 = vmul.f32 %v1254_v55, %v748_v32 }
  0xb5   : > { %v602_v35 = vpop.f32.mrf.mxu2  ;;  %v667_v36 = vpop.f32.mrf.mxu3 }
  0xb6   : > { %v603_v37 = vadd.f32 %v602_v35, %v423_v29  ;;  %v668_v38 = vadd.f32 %v667_v36, %v488_v30  ;;  %v820_v39 = vadd.f32 %v786_v34, %v785_v33 }
  0xb8   : > { %v717_v40 = vadd.f32 %v1243_v43, %v603_v37  ;;  %v718_v41 = vadd.f32 %v1245_v44, %v668_v38  ;;  %821 = vadd.xlane.f32.xlu1 %v820_v39  ;;  %v426_v42 = vpop.f32.mrf.mxu0  ;;  %v491_v45 = vpop.f32.mrf.mxu1 }
  0xba   : > { %v749_v46 = vmax.f32 %v717_v40, 0.0  ;;  %v750_v47 = vmax.f32 %v718_v41, 0.0 }
  0xbc   : > { %v787_v48 = vmul.f32 %v1252_v54, %v749_v46  ;;  %v788_v49 = vmul.f32 %v1254_v55, %v750_v47 }
  0xbd   : > { %v605_v50 = vpop.f32.mrf.mxu2  ;;  %v670_v51 = vpop.f32.mrf.mxu3 }
  0xbe   : > { %v606_v52 = vadd.f32 %v605_v50, %v426_v42  ;;  %v671_v53 = vadd.f32 %v670_v51, %v491_v45  ;;  %v823_v56 = vadd.f32 %v788_v49, %v787_v48 }
  0xc0   : > { %v719_v57 = vadd.f32 %v1243_v43, %v606_v52  ;;  %v720_v58 = vadd.f32 %v1245_v44, %v671_v53  ;;  %824 = vadd.xlane.f32.xlu2 %v823_v56  ;;  %v429_v59 = vpop.f32.mrf.mxu0  ;;  %v494_v60 = vpop.f32.mrf.mxu1 }
  0xc2   : > { %v751_v61 = vmax.f32 %v719_v57, 0.0  ;;  %v752_v62 = vmax.f32 %v720_v58, 0.0 }
  0xc4   : > { %v789_v63 = vmul.f32 %v1252_v54, %v751_v61  ;;  %v790_v0 = vmul.f32 %v1254_v55, %v752_v62 }
  0xc5   : > { %v608_v1 = vpop.f32.mrf.mxu2  ;;  %v673_v2 = vpop.f32.mrf.mxu3 }
  0xc6   : > { %v609_v3 = vadd.f32 %v608_v1, %v429_v59  ;;  %v674_v4 = vadd.f32 %v673_v2, %v494_v60  ;;  %v826_v5 = vadd.f32 %v790_v0, %v789_v63 }
  0xc8   : > { %v721_v6 = vadd.f32 %v1243_v43, %v609_v3  ;;  %v722_v7 = vadd.f32 %v1245_v44, %v674_v4  ;;  %827 = vadd.xlane.f32.xlu2 %v826_v5  ;;  %v432_v8 = vpop.f32.mrf.mxu0  ;;  %v497_v9 = vpop.f32.mrf.mxu1 }
  0xca   : > { %v753_v10 = vmax.f32 %v721_v6, 0.0  ;;  %v754_v11 = vmax.f32 %v722_v7, 0.0 }
  0xcc   : > { %v791_v12 = vmul.f32 %v1252_v54, %v753_v10  ;;  %v792_v13 = vmul.f32 %v1254_v55, %v754_v11 }
  0xcd   : > { %v611_v14 = vpop.f32.mrf.mxu2  ;;  %v676_v15 = vpop.f32.mrf.mxu3 }
  0xce   : > { %v612_v16 = vadd.f32 %v611_v14, %v432_v8  ;;  %v677_v17 = vadd.f32 %v676_v15, %v497_v9  ;;  %v829_v18 = vadd.f32 %v792_v13, %v791_v12 }
  0xd0   : > { %v723_v19 = vadd.f32 %v1243_v43, %v612_v16  ;;  %v724_v20 = vadd.f32 %v1245_v44, %v677_v17  ;;  %830 = vadd.xlane.f32.xlu0 %v829_v18  ;;  %v435_v21 = vpop.f32.mrf.mxu0  ;;  %v500_v22 = vpop.f32.mrf.mxu1 }
  0xd2   : > { %v755_v23 = vmax.f32 %v723_v19, 0.0  ;;  %v756_v24 = vmax.f32 %v724_v20, 0.0 }
  0xd4   : > { %v793_v25 = vmul.f32 %v1252_v54, %v755_v23  ;;  %v794_v26 = vmul.f32 %v1254_v55, %v756_v24 }
  0xd5   : > { %v614_v27 = vpop.f32.mrf.mxu2  ;;  %v679_v28 = vpop.f32.mrf.mxu3 }
  0xd6   : > { %v615_v29 = vadd.f32 %v614_v27, %v435_v21  ;;  %v680_v30 = vadd.f32 %v679_v28, %v500_v22  ;;  %v832_v31 = vadd.f32 %v794_v26, %v793_v25 }
  0xd8   : > { %v725_v32 = vadd.f32 %v1243_v43, %v615_v29  ;;  %v726_v33 = vadd.f32 %v1245_v44, %v680_v30  ;;  %833 = vadd.xlane.f32.xlu1 %v832_v31  ;;  %v438_v34 = vpop.f32.mrf.mxu0  ;;  %v503_v35 = vpop.f32.mrf.mxu1 }
  0xda   : > { %v757_v36 = vmax.f32 %v725_v32, 0.0  ;;  %v758_v37 = vmax.f32 %v726_v33, 0.0 }
  0xdc   : > { %v795_v38 = vmul.f32 %v1252_v54, %v757_v36  ;;  %v796_v39 = vmul.f32 %v1254_v55, %v758_v37 }
  0xdd   : > { %v617_v40 = vpop.f32.mrf.mxu2  ;;  %v682_v41 = vpop.f32.mrf.mxu3 }
  0xde   : > { %v618_v42 = vadd.f32 %v617_v40, %v438_v34  ;;  %v683_v45 = vadd.f32 %v682_v41, %v503_v35  ;;  %v835_v46 = vadd.f32 %v796_v39, %v795_v38 }
  0xe0   : > { %v727_v47 = vadd.f32 %v1243_v43, %v618_v42  ;;  %v728_v48 = vadd.f32 %v1245_v44, %v683_v45  ;;  %836 = vadd.xlane.f32.xlu2 %v835_v46  ;;  %v441_v49 = vpop.f32.mrf.mxu0  ;;  %v506_v50 = vpop.f32.mrf.mxu1 }
  0xe2   : > { %v759_v51 = vmax.f32 %v727_v47, 0.0  ;;  %v760_v52 = vmax.f32 %v728_v48, 0.0 }
  0xe4   : > { %v797_v53 = vmul.f32 %v1252_v54, %v759_v51  ;;  %v798_v56 = vmul.f32 %v1254_v55, %v760_v52 }
  0xe5   : > { %v620_v57 = vpop.f32.mrf.mxu2  ;;  %v685_v58 = vpop.f32.mrf.mxu3 }
  0xe6   : > { %v621_v59 = vadd.f32 %v620_v57, %v441_v49  ;;  %v686_v60 = vadd.f32 %v685_v58, %v506_v50  ;;  %v838_v61 = vadd.f32 %v798_v56, %v797_v53 }
  0xe8   : > { %v729_v62 = vadd.f32 %v1243_v43, %v621_v59  ;;  %v730_v63 = vadd.f32 %v1245_v44, %v686_v60  ;;  %839 = vadd.xlane.f32.xlu0 %v838_v61  ;;  %v444_v0 = vpop.f32.mrf.mxu0  ;;  %v509_v1 = vpop.f32.mrf.mxu1 }
  0xea   : > { %v761_v2 = vmax.f32 %v729_v62, 0.0  ;;  %v762_v3 = vmax.f32 %v730_v63, 0.0 }
  0xec   : > { %v799_v4 = vmul.f32 %v1252_v54, %v761_v2  ;;  %v800_v5 = vmul.f32 %v1254_v55, %v762_v3 }
  0xed   : > { %v623_v6 = vpop.f32.mrf.mxu2  ;;  %v688_v7 = vpop.f32.mrf.mxu3 }
  0xee   : > { %v624_v8 = vadd.f32 %v623_v6, %v444_v0  ;;  %v689_v9 = vadd.f32 %v688_v7, %v509_v1  ;;  %v841_v10 = vadd.f32 %v800_v5, %v799_v4  ;;  %v860_v5 = vstv %s859_s9 }
  0xf0   : > { %v731_v11 = vadd.f32 %v1243_v43, %v624_v8  ;;  %v732_v12 = vadd.f32 %v1245_v44, %v689_v9  ;;  %842 = vadd.xlane.f32.xlu1 %v841_v10  ;;  %v447_v13 = vpop.f32.mrf.mxu0  ;;  %v512_v14 = vpop.f32.mrf.mxu1 }
  0xf2   : > { %v763_v15 = vmax.f32 %v731_v11, 0.0  ;;  %v764_v16 = vmax.f32 %v732_v12, 0.0 }
  0xf4   : > { %v801_v17 = vmul.f32 %v1252_v54, %v763_v15  ;;  %v802_v18 = vmul.f32 %v1254_v55, %v764_v16 }
  0xf5   : > { %v626_v19 = vpop.f32.mrf.mxu2  ;;  %v691_v20 = vpop.f32.mrf.mxu3 }
  0xf6   : > { %v627_v21 = vadd.f32 %v626_v19, %v447_v13  ;;  %v692_v22 = vadd.f32 %v691_v20, %v512_v14  ;;  %v844_v23 = vadd.f32 %v802_v18, %v801_v17 }
  0xf8   : > { %v733_v24 = vadd.f32 %v1243_v43, %v627_v21  ;;  %v734_v25 = vadd.f32 %v1245_v44, %v692_v22  ;;  %845 = vadd.xlane.f32.xlu2 %v844_v23  ;;  %v450_v26 = vpop.f32.mrf.mxu0  ;;  %v515_v27 = vpop.f32.mrf.mxu1 }
  0xfa   : > { %v765_v28 = vmax.f32 %v733_v24, 0.0  ;;  %v766_v29 = vmax.f32 %v734_v25, 0.0 }
  0xfc   : > { %v803_v30 = vmul.f32 %v1252_v54, %v765_v28  ;;  %v804_v31 = vmul.f32 %v1254_v55, %v766_v29 }
  0xfd   : > { %v629_v32 = vpop.f32.mrf.mxu2  ;;  %v694_v33 = vpop.f32.mrf.mxu3 }
  0xfe   : > { %v630_v34 = vadd.f32 %v629_v32, %v450_v26  ;;  %v695_v35 = vadd.f32 %v694_v33, %v515_v27  ;;  %v847_v36 = vadd.f32 %v804_v31, %v803_v30 }
 0x100   : > { %v735_v37 = vadd.f32 %v1243_v43, %v630_v34  ;;  %v736_v38 = vadd.f32 %v1245_v44, %v695_v35  ;;  %848 = vadd.xlane.f32.xlu0 %v847_v36  ;;  %v453_v39 = vpop.f32.mrf.mxu0  ;;  %v518_v40 = vpop.f32.mrf.mxu1 }
 0x102   : > { %v767_v41 = vmax.f32 %v735_v37, 0.0  ;;  %v768_v42 = vmax.f32 %v736_v38, 0.0 }
 0x104   : > { %v805_v45 = vmul.f32 %v1252_v54, %v767_v41  ;;  %v806_v46 = vmul.f32 %v1254_v55, %v768_v42 }
 0x105   : > { %v632_v47 = vpop.f32.mrf.mxu2  ;;  %v697_v48 = vpop.f32.mrf.mxu3 }
 0x106   : > { %v633_v49 = vadd.f32 %v632_v47, %v453_v39  ;;  %v698_v50 = vadd.f32 %v697_v48, %v518_v40  ;;  %v850_v51 = vadd.f32 %v806_v46, %v805_v45 }
 0x108   : > { %v737_v52 = vadd.f32 %v1243_v43, %v633_v49  ;;  %v738_v53 = vadd.f32 %v1245_v44, %v698_v50  ;;  %851 = vadd.xlane.f32.xlu1 %v850_v51  ;;  %v456_v58 = vpop.f32.mrf.mxu0  ;;  %v521_v59 = vpop.f32.mrf.mxu1 }
 0x10a   : > { %v769_v56 = vmax.f32 %v737_v52, 0.0  ;;  %v770_v57 = vmax.f32 %v738_v53, 0.0 }
 0x10c   : > { %v807_v60 = vmul.f32 %v1252_v54, %v769_v56  ;;  %v808_v61 = vmul.f32 %v1254_v55, %v770_v57 }
 0x10d   : > { %v635_v62 = vpop.f32.mrf.mxu2  ;;  %v700_v63 = vpop.f32.mrf.mxu3 }
 0x10e   : > { %v636_v0 = vadd.f32 %v635_v62, %v456_v58  ;;  %v701_v1 = vadd.f32 %v700_v63, %v521_v59  ;;  %v853_v2 = vadd.f32 %v808_v61, %v807_v60 }
 0x110   : > { %v739_v3 = vadd.f32 %v1243_v43, %v636_v0  ;;  %v740_v4 = vadd.f32 %v1245_v44, %v701_v1  ;;  %854 = vadd.xlane.f32.xlu2 %v853_v2 }
 0x112   : > { %v771_v6 = vmax.f32 %v739_v3, 0.0  ;;  %v772_v7 = vmax.f32 %v740_v4, 0.0 }
 0x113   : > { %v813_v8 = vpop.xlane.xlu0 %812 }
 0x114   : > { %v861_v9 = vadd.f32 %v860_v5, %v813_v8  ;;  %v809_v43 = vmul.f32 %v1252_v54, %v771_v6  ;;  %v810_v44 = vmul.f32 %v1254_v55, %v772_v7 }
 0x116   : > { %878 = vst.msk [vmem:[%s1320_s12] sm:$0xff] %vm877_vm2, %v861_v9  ;;  %v856_v10 = vadd.f32 %v810_v44, %v809_v43 }
 0x118   : > { %857 = vadd.xlane.f32.xlu0 %v856_v10 }
 0x11b   : > { %v816_v11 = vpop.xlane.xlu0 %815 }
 0x11c   : > { %v862_v12 = vadd.f32 %v860_v5, %v816_v11 }
 0x11e   : > { %879 = vst.msk [vmem:[%s1320_s12 + $0x8] sm:$0xff] %vm877_vm2, %v862_v12 }
 0x123   : > { %v819_v13 = vpop.xlane.xlu1 %818 }
 0x124   : > { %v863_v14 = vadd.f32 %v860_v5, %v819_v13 }
 0x126   : > { %880 = vst.msk [vmem:[%s1320_s12 + $0x10] sm:$0xff] %vm877_vm2, %v863_v14 }
 0x12b   : > { %v822_v15 = vpop.xlane.xlu1 %821 }
 0x12c   : > { %v864_v54 = vadd.f32 %v860_v5, %v822_v15 }
 0x12e   : > { %881 = vst.msk [vmem:[%s1320_s12 + $0x18] sm:$0xff] %vm877_vm2, %v864_v54 }
 0x133   : > { %v825_v55 = vpop.xlane.xlu2 %824 }
 0x134   : > { %v865_v16 = vadd.f32 %v860_v5, %v825_v55 }
 0x136   : > { %882 = vst.msk [vmem:[%s1320_s12 + $0x20] sm:$0xff] %vm877_vm2, %v865_v16 }
 0x13b   : > { %v828_v17 = vpop.xlane.xlu2 %827 }
 0x13c   : > { %v866_v18 = vadd.f32 %v860_v5, %v828_v17 }
 0x13e   : > { %883 = vst.msk [vmem:[%s1320_s12 + $0x28] sm:$0xff] %vm877_vm2, %v866_v18 }
 0x143   : > { %v831_v19 = vpop.xlane.xlu0 %830 }
 0x144   : > { %v867_v20 = vadd.f32 %v860_v5, %v831_v19 }
 0x146   : > { %884 = vst.msk [vmem:[%s1320_s12 + $0x30] sm:$0xff] %vm877_vm2, %v867_v20 }
 0x14b   : > { %v834_v21 = vpop.xlane.xlu1 %833 }
 0x14c   : > { %v868_v22 = vadd.f32 %v860_v5, %v834_v21 }
 0x14e   : > { %885 = vst.msk [vmem:[%s1320_s12 + $0x38] sm:$0xff] %vm877_vm2, %v868_v22 }
 0x153   : > { %v837_v23 = vpop.xlane.xlu2 %836 }
 0x154   : > { %v869_v24 = vadd.f32 %v860_v5, %v837_v23 }
 0x156   : > { %886 = vst.msk [vmem:[%s1320_s12 + $0x40] sm:$0xff] %vm877_vm2, %v869_v24 }
 0x15b   : > { %v840_v25 = vpop.xlane.xlu0 %839 }
 0x15c   : > { %v870_v26 = vadd.f32 %v860_v5, %v840_v25 }
 0x15e   : > { %887 = vst.msk [vmem:[%s1320_s12 + $0x48] sm:$0xff] %vm877_vm2, %v870_v26 }
 0x163   : > { %v843_v27 = vpop.xlane.xlu1 %842 }
 0x164   : > { %v871_v28 = vadd.f32 %v860_v5, %v843_v27 }
 0x166   : > { %888 = vst.msk [vmem:[%s1320_s12 + $0x50] sm:$0xff] %vm877_vm2, %v871_v28 }
 0x16b   : > { %v846_v29 = vpop.xlane.xlu2 %845 }
 0x16c   : > { %v872_v30 = vadd.f32 %v860_v5, %v846_v29 }
 0x16e   : > { %889 = vst.msk [vmem:[%s1320_s12 + $0x58] sm:$0xff] %vm877_vm2, %v872_v30 }
 0x173   : > { %v849_v31 = vpop.xlane.xlu0 %848 }
 0x174   : > { %v873_v32 = vadd.f32 %v860_v5, %v849_v31 }
 0x176   : > { %890 = vst.msk [vmem:[%s1320_s12 + $0x60] sm:$0xff] %vm877_vm2, %v873_v32 }
 0x17b   : > { %v852_v33 = vpop.xlane.xlu1 %851 }
 0x17c   : > { %v874_v34 = vadd.f32 %v860_v5, %v852_v33 }
 0x17e   : > { %891 = vst.msk [vmem:[%s1320_s12 + $0x68] sm:$0xff] %vm877_vm2, %v874_v34 }
 0x183   : > { %v855_v35 = vpop.xlane.xlu2 %854 }
 0x184   : > { %v875_v36 = vadd.f32 %v860_v5, %v855_v35 }
 0x186   : > { %892 = vst.msk [vmem:[%s1320_s12 + $0x70] sm:$0xff] %vm877_vm2, %v875_v36 }
 0x18b   : > { %v858_v37 = vpop.xlane.xlu0 %857 }
 0x18c   : > { %v876_v38 = vadd.f32 %v860_v5, %v858_v37 }
 0x18e   : > { %893 = vst.msk [vmem:[%s1320_s12 + $0x78] sm:$0xff] %vm877_vm2, %v876_v38 }
 0x18f PF: > { %s18_s26 = sadd.s32 1, %s1053_s26  }
 0x190   : > { %p15_p4 = scmp.ge.s32.totalorder %s18_s26, 4  }
 0x192   :  { %17 = sbr.rel (!%p15_p4) target bundleno = 2 (0x2), region = 81 }

</bundles_post_ra>
